<compile_context>
chip_gen: v7x
topology: tpu7x:2x2x1
jax: 0.10.0
libtpu: 0.0.40
codegen_flags: <defaults>
</compile_context>

<pallas_src>
import math

import jax
import jax.numpy as jnp
from jax.experimental import pallas as pl
from jax.experimental.pallas import tpu as pltpu

P_DIM = 2.0   # registered buffer `p`
NU = 1.0      # registered buffer `nu`
LANES = 128
_LN2 = math.log(2.0)
# log(2) - 0.5 * p * log(2*pi) with p = 2
_CONST = math.log(2.0) - 0.5 * P_DIM * math.log(2.0 * math.pi)


def _log_kve1(z, lz):
    """log(kve(1, z)) = log(K_1(z) * exp(z)); A&S 9.8.3 / 9.8.7 / 9.8.8.

    `lz` must equal log(z). Written with plain jnp so it is reusable both
    inside the Pallas kernel and in the pure-JAX reference check.
    """
    # --- small-argument branch (0 < z <= 2): z*K_1(z) polynomial ---
    t = z * (1.0 / 3.75)
    t = t * t
    i1 = z * (0.5 + t * (0.87890594 + t * (0.51498869 + t * (0.15084934
         + t * (0.02658733 + t * (0.00301532 + t * 0.00032411))))))
    y = 0.25 * (z * z)
    z_k1 = (z * (lz - _LN2) * i1 + 1.0
            + y * (0.15443144 + y * (-0.67278579 + y * (-0.18156897
            + y * (-0.01919402 + y * (-0.00110404 + y * (-0.00004686)))))))
    # log(kve) = log(z*K1(z)) - log(z) + z  (z <= 2 so no overflow; the clamps
    # only sanitize the un-selected lanes of the jnp.where below).
    log_small = jnp.log(jnp.maximum(z_k1, 1e-30)) - lz + jnp.minimum(z, 2.0)

    # --- large-argument branch (z >= 2): sqrt(z)*exp(z)*K_1(z) polynomial ---
    w = 2.0 / jnp.maximum(z, 1e-30)
    poly = (1.25331414 + w * (0.23498619 + w * (-0.03655620 + w * (0.01504268
            + w * (-0.00780353 + w * (0.00325614 + w * (-0.00068245)))))))
    log_large = jnp.log(jnp.maximum(poly, 1e-30)) - 0.5 * lz

    return jnp.where(z <= 2.0, log_small, log_large)


def _make_kernel(batch, tile_s):
    per_tile = tile_s * LANES
    n_groups = tile_s // 8

    def kernel(packed_ref, nlp_ref, psum_ref):
        # packed_ref block: (9, tile_s, 128); each component is a dense vreg slab.
        loc0 = packed_ref[0]
        loc1 = packed_ref[1]
        m0 = packed_ref[2]
        m1 = packed_ref[3]
        x0 = packed_ref[4]
        x1 = packed_ref[5]
        a = packed_ref[6]    # L[0, 0]
        b = packed_ref[7]    # L[1, 0]
        c = packed_ref[8]    # L[1, 1]

        d0 = x0 - loc0
        d1 = x1 - loc1

        # Sinv = (L L^T)^{-1} in closed form for 2x2 lower-triangular L.
        a2 = a * a
        c2 = c * c
        det_s = a2 * c2                               # det(L L^T)
        inv_det = pl.reciprocal(det_s, approx=True)   # EUP, frees VALU slots
        s00 = (b * b + c2) * inv_det
        s01 = -(a * b) * inv_det
        s11 = a2 * inv_det
        logdet_sinv = -jnp.log(det_s)                 # logdet(Sinv)

        def quad(u0, u1, v0, v1):
            return u0 * v0 * s00 + (u0 * v1 + u1 * v0) * s01 + u1 * v1 * s11

        m_sinv_m = quad(m0, m1, m0, m1)
        x_sinv_x = quad(d0, d1, d0, d1)
        x_sinv_m = quad(d0, d1, m0, m1)

        two_m = 2.0 + m_sinv_m
        la = jnp.log(x_sinv_x)          # reused by nu-term and log(z)
        lb = jnp.log(two_m)
        z = jnp.sqrt(two_m * x_sinv_x)
        lz = 0.5 * (la + lb)            # = log(z), no extra transcendental

        log_kve = _log_kve1(z, lz)

        log_prob = (_CONST + x_sinv_m
                    + 0.5 * logdet_sinv
                    + 0.5 * NU * (la - lb)
                    + log_kve - z)
        neg_lp = -log_prob
        nlp_ref[...] = neg_lp           # lane-dense, unmasked store

        # Masked per-tile partial sum (padded lanes contribute 0).
        tile = pl.program_id(0)
        sub = jax.lax.broadcasted_iota(jnp.int32, (tile_s, LANES), 0)
        lane = jax.lax.broadcasted_iota(jnp.int32, (tile_s, LANES), 1)
        idx = tile * per_tile + sub * LANES + lane
        masked = jnp.where(idx < batch, neg_lp, 0.0)

        # Reduce sublane groups with plain vreg adds; keep an (8, 128)
        # tile-aligned result (final tiny reduction happens in the wrapper).
        partial = masked[0:8, :]
        for g in range(1, n_groups):
            partial = partial + masked[8 * g:8 * (g + 1), :]
        psum_ref[0] = partial

    return kernel


def gal_nll_loss_2d(loc, m, L, x, reduce=True, tile_s=256):
    """Pallas TPU forward pass of GALNLLLoss2d.

    loc, m, x: (B, 2) float; L: (B, 2, 2) lower-triangular Cholesky factor.
    """
    loc = jnp.asarray(loc, jnp.float32)
    m = jnp.asarray(m, jnp.float32)
    L = jnp.asarray(L, jnp.float32)
    x = jnp.asarray(x, jnp.float32)
    B = loc.shape[0]

    s_needed = -(-B // LANES)                       # ceil(B / 128) sublanes
    s_rounded = max(8, -(-s_needed // 8) * 8)       # multiple of 8 sublanes
    tile_s = max(8, (min(tile_s, s_rounded) // 8) * 8)
    num_tiles = -(-s_rounded // tile_s)
    s_pad = num_tiles * tile_s
    b_pad = s_pad * LANES

    # One fused packed input: rows = [loc0, loc1, m0, m1, x0, x1, L00, L10, L11].
    comps = jnp.stack([loc[:, 0], loc[:, 1],
                       m[:, 0], m[:, 1],
                       x[:, 0], x[:, 1],
                       L[:, 0, 0], L[:, 1, 0], L[:, 1, 1]], axis=0)   # (9, B)
    if b_pad > B:
        # Safe pad values (x - loc = 1, L = I) keep padded lanes finite;
        # they are masked out of the loss inside the kernel.
        fill = jnp.array([0., 0., 0., 0., 1., 1., 1., 0., 1.],
                         jnp.float32)[:, None]
        comps = jnp.concatenate(
            [comps, jnp.broadcast_to(fill, (9, b_pad - B))], axis=1)
    packed = comps.reshape(9, s_pad, LANES)

    kernel = _make_kernel(B, tile_s)
    nlp, psum = pl.pallas_call(
        kernel,
        out_shape=(jax.ShapeDtypeStruct((s_pad, LANES), jnp.float32),
                   jax.ShapeDtypeStruct((num_tiles, 8, LANES), jnp.float32)),
        grid_spec=pltpu.PrefetchScalarGridSpec(
            num_scalar_prefetch=0,
            grid=(num_tiles,),
            in_specs=[pl.BlockSpec((9, tile_s, LANES), lambda i: (0, i, 0))],
            out_specs=(pl.BlockSpec((tile_s, LANES), lambda i: (i, 0)),
                       pl.BlockSpec((1, 8, LANES), lambda i: (i, 0, 0)))),
        compiler_params=pltpu.CompilerParams(
            dimension_semantics=("parallel",)),
    )(packed)

    if reduce:
        return jnp.sum(psum) / B
    return nlp.reshape(-1)[:B]


def _reference_nlp(loc, m, L, x):
    """Pure-JAX reference of the PyTorch forward (no reduction)."""
    diff = x - loc
    sigma = jnp.einsum('bij,bkj->bik', L, L)
    sinv = jnp.linalg.inv(sigma)
    m_s_m = jnp.einsum('bi,bij,bj->b', m, sinv, m)
    x_s_x = jnp.einsum('bi,bij,bj->b', diff, sinv, diff)
    x_s_m = jnp.einsum('bi,bij,bj->b', diff, sinv, m)
    z = jnp.sqrt((2.0 + m_s_m) * x_s_x)
    logdet_sinv = -jnp.log(jnp.linalg.det(sigma))
    log_prob = (_CONST + x_s_m + 0.5 * logdet_sinv
                + 0.5 * NU * jnp.log(x_s_x / (2.0 + m_s_m))
                + _log_kve1(z, jnp.log(z)) - z)
    return -log_prob


if __name__ == "__main__":
    key = jax.random.PRNGKey(0)
    B = 8                                    # batch
    k1, k2, k3, k4, k5 = jax.random.split(key, 5)

    loc = jax.random.normal(k1, (B, 2), jnp.float32)
    m = 0.5 * jax.random.normal(k2, (B, 2), jnp.float32)
    x = loc + jax.random.normal(k3, (B, 2), jnp.float32)

    # lower-triangular Cholesky factor with positive diagonal
    diag = 0.5 + jnp.abs(jax.random.normal(k4, (B, 2), jnp.float32))
    off = 0.3 * jax.random.normal(k5, (B,), jnp.float32)
    L = jnp.zeros((B, 2, 2), jnp.float32)
    L = L.at[:, 0, 0].set(diag[:, 0])
    L = L.at[:, 1, 1].set(diag[:, 1])
    L = L.at[:, 1, 0].set(off)

    loss = gal_nll_loss_2d(loc, m, L, x, reduce=True)
    per_sample = gal_nll_loss_2d(loc, m, L, x, reduce=False)
    jax.block_until_ready((loss, per_sample))

    ref_nlp = _reference_nlp(loc, m, L, x)
    ref_loss = jnp.mean(ref_nlp)

    assert loss.shape == ()
    assert per_sample.shape == (B,)
    assert bool(jnp.isfinite(loss))
    assert bool(jnp.all(jnp.isfinite(per_sample)))
    assert bool(jnp.allclose(per_sample, ref_nlp, rtol=5e-3, atol=5e-3))
    assert bool(jnp.allclose(loss, ref_loss, rtol=5e-3, atol=5e-3))
    print("KERNEL_OK")
</pallas_src>

<mosaic_0001>
module attributes {stable_mosaic.version = 11 : i64} {
  func.func @kernel(%arg0: i32, %arg1: memref<9x8x128xf32, #tpu.memory_space<vmem>>, %arg2: memref<8x128xf32, #tpu.memory_space<vmem>>, %arg3: memref<1x8x128xf32, #tpu.memory_space<vmem>>) attributes {dimension_semantics = [#tpu.dimension_semantics<parallel>], iteration_bounds = array<i64: 1>, scalar_prefetch = 0 : i64, scratch_operands = 0 : i64, tpu.core_type = #tpu.core_type<tc>, window_params = [{transform_indices = @transform_0, window_bounds = array<i64: 9, 8, 128>}, {transform_indices = @transform_1, window_bounds = array<i64: 8, 128>}, {transform_indices = @transform_2, window_bounds = array<i64: 1, 8, 128>}]} {
    %c0 = arith.constant 0 : index
    %c0_0 = arith.constant 0 : index
    %c0_1 = arith.constant 0 : index
    %0 = vector.load %arg1[%c0, %c0_0, %c0_1] : memref<9x8x128xf32, #tpu.memory_space<vmem>>, vector<1x8x128xf32>
    %1 = vector.shape_cast %0 : vector<1x8x128xf32> to vector<8x128xf32>
    %c1 = arith.constant 1 : index
    %c0_2 = arith.constant 0 : index
    %c0_3 = arith.constant 0 : index
    %2 = vector.load %arg1[%c1, %c0_2, %c0_3] : memref<9x8x128xf32, #tpu.memory_space<vmem>>, vector<1x8x128xf32>
    %3 = vector.shape_cast %2 : vector<1x8x128xf32> to vector<8x128xf32>
    %c2 = arith.constant 2 : index
    %c0_4 = arith.constant 0 : index
    %c0_5 = arith.constant 0 : index
    %4 = vector.load %arg1[%c2, %c0_4, %c0_5] : memref<9x8x128xf32, #tpu.memory_space<vmem>>, vector<1x8x128xf32>
    %5 = vector.shape_cast %4 : vector<1x8x128xf32> to vector<8x128xf32>
    %c3 = arith.constant 3 : index
    %c0_6 = arith.constant 0 : index
    %c0_7 = arith.constant 0 : index
    %6 = vector.load %arg1[%c3, %c0_6, %c0_7] : memref<9x8x128xf32, #tpu.memory_space<vmem>>, vector<1x8x128xf32>
    %7 = vector.shape_cast %6 : vector<1x8x128xf32> to vector<8x128xf32>
    %c4 = arith.constant 4 : index
    %c0_8 = arith.constant 0 : index
    %c0_9 = arith.constant 0 : index
    %8 = vector.load %arg1[%c4, %c0_8, %c0_9] : memref<9x8x128xf32, #tpu.memory_space<vmem>>, vector<1x8x128xf32>
    %9 = vector.shape_cast %8 : vector<1x8x128xf32> to vector<8x128xf32>
    %c5 = arith.constant 5 : index
    %c0_10 = arith.constant 0 : index
    %c0_11 = arith.constant 0 : index
    %10 = vector.load %arg1[%c5, %c0_10, %c0_11] : memref<9x8x128xf32, #tpu.memory_space<vmem>>, vector<1x8x128xf32>
    %11 = vector.shape_cast %10 : vector<1x8x128xf32> to vector<8x128xf32>
    %c6 = arith.constant 6 : index
    %c0_12 = arith.constant 0 : index
    %c0_13 = arith.constant 0 : index
    %12 = vector.load %arg1[%c6, %c0_12, %c0_13] : memref<9x8x128xf32, #tpu.memory_space<vmem>>, vector<1x8x128xf32>
    %13 = vector.shape_cast %12 : vector<1x8x128xf32> to vector<8x128xf32>
    %c7 = arith.constant 7 : index
    %c0_14 = arith.constant 0 : index
    %c0_15 = arith.constant 0 : index
    %14 = vector.load %arg1[%c7, %c0_14, %c0_15] : memref<9x8x128xf32, #tpu.memory_space<vmem>>, vector<1x8x128xf32>
    %15 = vector.shape_cast %14 : vector<1x8x128xf32> to vector<8x128xf32>
    %c8 = arith.constant 8 : index
    %c0_16 = arith.constant 0 : index
    %c0_17 = arith.constant 0 : index
    %16 = vector.load %arg1[%c8, %c0_16, %c0_17] : memref<9x8x128xf32, #tpu.memory_space<vmem>>, vector<1x8x128xf32>
    %17 = vector.shape_cast %16 : vector<1x8x128xf32> to vector<8x128xf32>
    %18 = arith.subf %9, %1 : vector<8x128xf32>
    %19 = arith.subf %11, %3 : vector<8x128xf32>
    %20 = arith.mulf %13, %13 : vector<8x128xf32>
    %21 = arith.mulf %17, %17 : vector<8x128xf32>
    %22 = arith.mulf %20, %21 : vector<8x128xf32>
    %23 = tpu.reciprocal %22 {approx = true} : vector<8x128xf32> -> vector<8x128xf32>
    %24 = arith.mulf %15, %15 : vector<8x128xf32>
    %25 = arith.addf %24, %21 : vector<8x128xf32>
    %26 = arith.mulf %25, %23 : vector<8x128xf32>
    %27 = arith.mulf %13, %15 : vector<8x128xf32>
    %cst = arith.constant 0.000000e+00 : f32
    %28 = vector.broadcast %cst : f32 to vector<8x128xf32>
    %29 = arith.subf %28, %27 : vector<8x128xf32>
    %30 = arith.mulf %29, %23 : vector<8x128xf32>
    %31 = arith.mulf %20, %23 : vector<8x128xf32>
    %32 = math.log %22 : vector<8x128xf32>
    %cst_18 = arith.constant 0.000000e+00 : f32
    %33 = vector.broadcast %cst_18 : f32 to vector<8x128xf32>
    %34 = arith.subf %33, %32 : vector<8x128xf32>
    %35 = arith.mulf %5, %5 : vector<8x128xf32>
    %36 = arith.mulf %35, %26 : vector<8x128xf32>
    %37 = arith.mulf %5, %7 : vector<8x128xf32>
    %38 = arith.mulf %7, %5 : vector<8x128xf32>
    %39 = arith.addf %37, %38 : vector<8x128xf32>
    %40 = arith.mulf %39, %30 : vector<8x128xf32>
    %41 = arith.addf %36, %40 : vector<8x128xf32>
    %42 = arith.mulf %7, %7 : vector<8x128xf32>
    %43 = arith.mulf %42, %31 : vector<8x128xf32>
    %44 = arith.addf %41, %43 : vector<8x128xf32>
    %45 = arith.mulf %18, %18 : vector<8x128xf32>
    %46 = arith.mulf %45, %26 : vector<8x128xf32>
    %47 = arith.mulf %18, %19 : vector<8x128xf32>
    %48 = arith.mulf %19, %18 : vector<8x128xf32>
    %49 = arith.addf %47, %48 : vector<8x128xf32>
    %50 = arith.mulf %49, %30 : vector<8x128xf32>
    %51 = arith.addf %46, %50 : vector<8x128xf32>
    %52 = arith.mulf %19, %19 : vector<8x128xf32>
    %53 = arith.mulf %52, %31 : vector<8x128xf32>
    %54 = arith.addf %51, %53 : vector<8x128xf32>
    %55 = arith.mulf %18, %5 : vector<8x128xf32>
    %56 = arith.mulf %55, %26 : vector<8x128xf32>
    %57 = arith.mulf %18, %7 : vector<8x128xf32>
    %58 = arith.mulf %19, %5 : vector<8x128xf32>
    %59 = arith.addf %57, %58 : vector<8x128xf32>
    %60 = arith.mulf %59, %30 : vector<8x128xf32>
    %61 = arith.addf %56, %60 : vector<8x128xf32>
    %62 = arith.mulf %19, %7 : vector<8x128xf32>
    %63 = arith.mulf %62, %31 : vector<8x128xf32>
    %64 = arith.addf %61, %63 : vector<8x128xf32>
    %cst_19 = arith.constant 2.000000e+00 : f32
    %65 = vector.broadcast %cst_19 : f32 to vector<8x128xf32>
    %66 = arith.addf %65, %44 : vector<8x128xf32>
    %67 = math.log %54 : vector<8x128xf32>
    %68 = math.log %66 : vector<8x128xf32>
    %69 = arith.mulf %66, %54 : vector<8x128xf32>
    %70 = math.sqrt %69 : vector<8x128xf32>
    %71 = arith.addf %67, %68 : vector<8x128xf32>
    %cst_20 = arith.constant 5.000000e-01 : f32
    %72 = vector.broadcast %cst_20 : f32 to vector<8x128xf32>
    %73 = arith.mulf %72, %71 : vector<8x128xf32>
    %cst_21 = arith.constant 0.266666681 : f32
    %74 = vector.broadcast %cst_21 : f32 to vector<8x128xf32>
    %75 = arith.mulf %70, %74 : vector<8x128xf32>
    %76 = arith.mulf %75, %75 : vector<8x128xf32>
    %cst_22 = arith.constant 3.241100e-04 : f32
    %77 = vector.broadcast %cst_22 : f32 to vector<8x128xf32>
    %78 = arith.mulf %76, %77 : vector<8x128xf32>
    %cst_23 = arith.constant 3.015320e-03 : f32
    %79 = vector.broadcast %cst_23 : f32 to vector<8x128xf32>
    %80 = arith.addf %79, %78 : vector<8x128xf32>
    %81 = arith.mulf %76, %80 : vector<8x128xf32>
    %cst_24 = arith.constant 0.0265873298 : f32
    %82 = vector.broadcast %cst_24 : f32 to vector<8x128xf32>
    %83 = arith.addf %82, %81 : vector<8x128xf32>
    %84 = arith.mulf %76, %83 : vector<8x128xf32>
    %cst_25 = arith.constant 0.150849342 : f32
    %85 = vector.broadcast %cst_25 : f32 to vector<8x128xf32>
    %86 = arith.addf %85, %84 : vector<8x128xf32>
    %87 = arith.mulf %76, %86 : vector<8x128xf32>
    %cst_26 = arith.constant 0.514988661 : f32
    %88 = vector.broadcast %cst_26 : f32 to vector<8x128xf32>
    %89 = arith.addf %88, %87 : vector<8x128xf32>
    %90 = arith.mulf %76, %89 : vector<8x128xf32>
    %cst_27 = arith.constant 0.878905951 : f32
    %91 = vector.broadcast %cst_27 : f32 to vector<8x128xf32>
    %92 = arith.addf %91, %90 : vector<8x128xf32>
    %93 = arith.mulf %76, %92 : vector<8x128xf32>
    %cst_28 = arith.constant 5.000000e-01 : f32
    %94 = vector.broadcast %cst_28 : f32 to vector<8x128xf32>
    %95 = arith.addf %94, %93 : vector<8x128xf32>
    %96 = arith.mulf %70, %95 : vector<8x128xf32>
    %97 = arith.mulf %70, %70 : vector<8x128xf32>
    %cst_29 = arith.constant 2.500000e-01 : f32
    %98 = vector.broadcast %cst_29 : f32 to vector<8x128xf32>
    %99 = arith.mulf %98, %97 : vector<8x128xf32>
    %cst_30 = arith.constant 0.693147182 : f32
    %100 = vector.broadcast %cst_30 : f32 to vector<8x128xf32>
    %101 = arith.subf %73, %100 : vector<8x128xf32>
    %102 = arith.mulf %70, %101 : vector<8x128xf32>
    %103 = arith.mulf %102, %96 : vector<8x128xf32>
    %cst_31 = arith.constant 1.000000e+00 : f32
    %104 = vector.broadcast %cst_31 : f32 to vector<8x128xf32>
    %105 = arith.addf %103, %104 : vector<8x128xf32>
    %cst_32 = arith.constant -4.686000e-05 : f32
    %106 = vector.broadcast %cst_32 : f32 to vector<8x128xf32>
    %107 = arith.mulf %99, %106 : vector<8x128xf32>
    %cst_33 = arith.constant -1.104040e-03 : f32
    %108 = vector.broadcast %cst_33 : f32 to vector<8x128xf32>
    %109 = arith.addf %108, %107 : vector<8x128xf32>
    %110 = arith.mulf %99, %109 : vector<8x128xf32>
    %cst_34 = arith.constant -0.01919402 : f32
    %111 = vector.broadcast %cst_34 : f32 to vector<8x128xf32>
    %112 = arith.addf %111, %110 : vector<8x128xf32>
    %113 = arith.mulf %99, %112 : vector<8x128xf32>
    %cst_35 = arith.constant -0.181568965 : f32
    %114 = vector.broadcast %cst_35 : f32 to vector<8x128xf32>
    %115 = arith.addf %114, %113 : vector<8x128xf32>
    %116 = arith.mulf %99, %115 : vector<8x128xf32>
    %cst_36 = arith.constant -0.672785818 : f32
    %117 = vector.broadcast %cst_36 : f32 to vector<8x128xf32>
    %118 = arith.addf %117, %116 : vector<8x128xf32>
    %119 = arith.mulf %99, %118 : vector<8x128xf32>
    %cst_37 = arith.constant 0.154431447 : f32
    %120 = vector.broadcast %cst_37 : f32 to vector<8x128xf32>
    %121 = arith.addf %120, %119 : vector<8x128xf32>
    %122 = arith.mulf %99, %121 : vector<8x128xf32>
    %123 = arith.addf %105, %122 : vector<8x128xf32>
    %cst_38 = arith.constant 1.000000e-30 : f32
    %124 = vector.broadcast %cst_38 : f32 to vector<8x128xf32>
    %125 = arith.maximumf %123, %124 : vector<8x128xf32>
    %126 = math.log %125 : vector<8x128xf32>
    %127 = arith.subf %126, %73 : vector<8x128xf32>
    %cst_39 = arith.constant 2.000000e+00 : f32
    %128 = vector.broadcast %cst_39 : f32 to vector<8x128xf32>
    %129 = arith.minimumf %70, %128 : vector<8x128xf32>
    %130 = arith.addf %127, %129 : vector<8x128xf32>
    %cst_40 = arith.constant 1.000000e-30 : f32
    %131 = vector.broadcast %cst_40 : f32 to vector<8x128xf32>
    %132 = arith.maximumf %70, %131 : vector<8x128xf32>
    %cst_41 = arith.constant 2.000000e+00 : f32
    %133 = vector.broadcast %cst_41 : f32 to vector<8x128xf32>
    %134 = arith.divf %133, %132 : vector<8x128xf32>
    %cst_42 = arith.constant -6.824500e-04 : f32
    %135 = vector.broadcast %cst_42 : f32 to vector<8x128xf32>
    %136 = arith.mulf %134, %135 : vector<8x128xf32>
    %cst_43 = arith.constant 3.256140e-03 : f32
    %137 = vector.broadcast %cst_43 : f32 to vector<8x128xf32>
    %138 = arith.addf %137, %136 : vector<8x128xf32>
    %139 = arith.mulf %134, %138 : vector<8x128xf32>
    %cst_44 = arith.constant -7.803530e-03 : f32
    %140 = vector.broadcast %cst_44 : f32 to vector<8x128xf32>
    %141 = arith.addf %140, %139 : vector<8x128xf32>
    %142 = arith.mulf %134, %141 : vector<8x128xf32>
    %cst_45 = arith.constant 0.0150426803 : f32
    %143 = vector.broadcast %cst_45 : f32 to vector<8x128xf32>
    %144 = arith.addf %143, %142 : vector<8x128xf32>
    %145 = arith.mulf %134, %144 : vector<8x128xf32>
    %cst_46 = arith.constant -3.655620e-02 : f32
    %146 = vector.broadcast %cst_46 : f32 to vector<8x128xf32>
    %147 = arith.addf %146, %145 : vector<8x128xf32>
    %148 = arith.mulf %134, %147 : vector<8x128xf32>
    %cst_47 = arith.constant 0.234986186 : f32
    %149 = vector.broadcast %cst_47 : f32 to vector<8x128xf32>
    %150 = arith.addf %149, %148 : vector<8x128xf32>
    %151 = arith.mulf %134, %150 : vector<8x128xf32>
    %cst_48 = arith.constant 1.25331414 : f32
    %152 = vector.broadcast %cst_48 : f32 to vector<8x128xf32>
    %153 = arith.addf %152, %151 : vector<8x128xf32>
    %cst_49 = arith.constant 1.000000e-30 : f32
    %154 = vector.broadcast %cst_49 : f32 to vector<8x128xf32>
    %155 = arith.maximumf %153, %154 : vector<8x128xf32>
    %156 = math.log %155 : vector<8x128xf32>
    %cst_50 = arith.constant 5.000000e-01 : f32
    %157 = vector.broadcast %cst_50 : f32 to vector<8x128xf32>
    %158 = arith.mulf %157, %73 : vector<8x128xf32>
    %159 = arith.subf %156, %158 : vector<8x128xf32>
    %cst_51 = arith.constant 2.000000e+00 : f32
    %160 = vector.broadcast %cst_51 : f32 to vector<8x128xf32>
    %161 = arith.cmpf ole, %70, %160 : vector<8x128xf32>
    %162 = arith.select %161, %130, %159 : vector<8x128xi1>, vector<8x128xf32>
    %cst_52 = arith.constant -1.14472985 : f32
    %163 = vector.broadcast %cst_52 : f32 to vector<8x128xf32>
    %164 = arith.addf %163, %64 : vector<8x128xf32>
    %cst_53 = arith.constant 5.000000e-01 : f32
    %165 = vector.broadcast %cst_53 : f32 to vector<8x128xf32>
    %166 = arith.mulf %165, %34 : vector<8x128xf32>
    %167 = arith.addf %164, %166 : vector<8x128xf32>
    %168 = arith.subf %67, %68 : vector<8x128xf32>
    %cst_54 = arith.constant 5.000000e-01 : f32
    %169 = vector.broadcast %cst_54 : f32 to vector<8x128xf32>
    %170 = arith.mulf %169, %168 : vector<8x128xf32>
    %171 = arith.addf %167, %170 : vector<8x128xf32>
    %172 = arith.addf %171, %162 : vector<8x128xf32>
    %173 = arith.subf %172, %70 : vector<8x128xf32>
    %cst_55 = arith.constant 0.000000e+00 : f32
    %174 = vector.broadcast %cst_55 : f32 to vector<8x128xf32>
    %175 = arith.subf %174, %173 : vector<8x128xf32>
    %c0_56 = arith.constant 0 : index
    %c0_57 = arith.constant 0 : index
    %176 = vector.load %arg2[%c0_56, %c0_57] : memref<8x128xf32, #tpu.memory_space<vmem>>, vector<8x128xf32>
    tpu.vector_store %arg2[%c0_56, %c0_57], %175 {strides = array<i32>} : memref<8x128xf32, #tpu.memory_space<vmem>>, vector<8x128xf32>,
    %177 = tpu.iota {dimensions = array<i32: 0>} : vector<8x128xi32>
    %178 = tpu.iota {dimensions = array<i32: 1>} : vector<8x128xi32>
    %c1024_i32 = arith.constant 1024 : i32
    %179 = arith.muli %arg0, %c1024_i32 : i32
    %c128_i32 = arith.constant 128 : i32
    %180 = vector.broadcast %c128_i32 : i32 to vector<8x128xi32>
    %181 = arith.muli %177, %180 : vector<8x128xi32>
    %182 = vector.broadcast %179 : i32 to vector<8x128xi32>
    %183 = arith.addi %182, %181 : vector<8x128xi32>
    %184 = arith.addi %183, %178 : vector<8x128xi32>
    %c8_i32 = arith.constant 8 : i32
    %185 = vector.broadcast %c8_i32 : i32 to vector<8x128xi32>
    %186 = arith.cmpi slt, %184, %185 : vector<8x128xi32>
    %cst_58 = arith.constant 0.000000e+00 : f32
    %187 = vector.broadcast %cst_58 : f32 to vector<8x128xf32>
    %188 = arith.select %186, %175, %187 : vector<8x128xi1>, vector<8x128xf32>
    %c0_59 = arith.constant 0 : index
    %c0_60 = arith.constant 0 : index
    %c0_61 = arith.constant 0 : index
    %189 = vector.load %arg3[%c0_59, %c0_60, %c0_61] : memref<1x8x128xf32, #tpu.memory_space<vmem>>, vector<1x8x128xf32>
    %190 = vector.shape_cast %189 : vector<1x8x128xf32> to vector<8x128xf32>
    %191 = vector.shape_cast %188 : vector<8x128xf32> to vector<1x8x128xf32>
    tpu.vector_store %arg3[%c0_59, %c0_60, %c0_61], %191 {strides = array<i32>} : memref<1x8x128xf32, #tpu.memory_space<vmem>>, vector<1x8x128xf32>,
    return
  }
  func.func @transform_0(%arg0: i32) -> (i32, i32, i32) {
    %c0_i32 = arith.constant 0 : i32
    %c0_i32_0 = arith.constant 0 : i32
    %c0_i32_1 = arith.constant 0 : i32
    return %c0_i32, %arg0, %c0_i32_0 : i32, i32, i32
  }
  func.func @transform_1(%arg0: i32) -> (i32, i32) {
    %c0_i32 = arith.constant 0 : i32
    %c0_i32_0 = arith.constant 0 : i32
    return %arg0, %c0_i32 : i32, i32
  }
  func.func @transform_2(%arg0: i32) -> (i32, i32, i32) {
    %c0_i32 = arith.constant 0 : i32
    %c0_i32_0 = arith.constant 0 : i32
    %c0_i32_1 = arith.constant 0 : i32
    return %arg0, %c0_i32, %c0_i32_0 : i32, i32, i32
  }
}

</mosaic_0001>

<bundles_post_ra>
// kernel: tpu_custom_call.1
= control target key start
LH: loop header
LB: loop body
LE: loop exit
PB: predicated region body
PF: predicated region fallthrough
CT: control target
= control target key end

     0   :  { %8 = vsyncpa [#allocation3], 0  ;;  %s385_s0 = inlined_call_operand.hbm [shape: f32[9,8,128], index: 0, kind: input, shape index: {}]   ;;  %s386_s1 = inlined_call_operand.hbm [shape: f32[8,128], index: 1, kind: output, shape index: {0}]   ;;  %s387_s2 = inlined_call_operand.hbm [shape: f32[1,8,128], index: 2, kind: output, shape index: {1}]  }
   0x1   :  { %9 = vsyncpa [#allocation4], 0 }
   0x2   :  { %10 = vsyncpa [#allocation7], 0  ;;  %s308_s9 = smov [#allocation2]   ;;  %s236_s13 = scalar_lea.hbm %s385_s0, 1152 }
   0x3   :  { %s16_s10 = sshll.u32 %s308_s9, 4  ;;  %p237_p0 = scmp.ne.s32.totalorder %s385_s0, %s236_s13  ;;  %s17_s10 = int_to_ptr.vmem [resolvable:$true] %s16_s10 }
   0x4   :  { %p240_p1 = scmp.lt.u32.totalorder %s236_s13, %s385_s0 }
   0x6   :  { %p242_p2 = pnand %p240_p1, %p237_p0 }
   0x8   :  { %245 = shalt.err (!%p242_p2)
}
   0x9   :  { %s246_s18 = scalar_lea.vmem %s17_s10, 1152  ;;  %p251_p4 = scmp.lt.s32.totalorder %s17_s10, %s17_s10 }
   0xa   :  { %p247_p3 = scmp.ne.s32.totalorder %s17_s10, %s246_s18  ;;  %p252_p5 = scmp.lt.s32.totalorder %s246_s18, %s246_s18 }
   0xc   :  { %p253_p6 = por %p252_p5, %p251_p4 }
   0xe   :  { %p254_p7 = pnand %p253_p6, %p247_p3 }
  0x10   :  { %257 = shalt.err (!%p254_p7)
}
  0x11   :  { %s309_s19 = smov 128   ;;  %s310_s20 = smov 8  }
  0x12   :  { %22 = dma.hbm_to_vmem [thread:$0]  %s385_s0, 1152, %s17_s10, [#allocation3], %s309_s19, %s309_s19, %s310_s20  }
  0x13   :  { %302 = dma.done.wait [#allocation3], 1152  }
  0x14   :  { %303 = vsyncadd [#allocation3], 4294966144  ;;  %v26_v0 = vld [vmem:[#allocation2] sm:$0xff]  ;;  %v28_v1 = vld [vmem:[#allocation2 + $0x8] sm:$0xff]  ;;  %s311_s0 = smov [#allocation5]   ;;  %s312_s24 = smov [#allocation6]  }
  0x15   :  { %v34_v2 = vld [vmem:[#allocation2 + $0x20] sm:$0xff]  ;;  %v36_v3 = vld [vmem:[#allocation2 + $0x28] sm:$0xff]  ;;  %v38_v4 = vld [vmem:[#allocation2 + $0x30] sm:$0xff]  ;;  %s191_s23 = sshll.u32 %s311_s0, 4  ;;  %s201_s25 = sshll.u32 %s312_s24, 4  ;;  %s192_s23 = int_to_ptr.vmem [resolvable:$true] %s191_s23  ;;  %s354_s25 = int_to_ptr.vmem [resolvable:$true] %s201_s25 }
  0x16   :  { %v42_v5 = vld [vmem:[#allocation2 + $0x40] sm:$0xff]  ;;  %v43_v6 = vsub.f32 %v34_v2, %v26_v0  ;;  %v45_v7 = vmul.f32 %v38_v4, %v38_v4  ;;  %v30_v9 = vld [vmem:[#allocation2 + $0x10] sm:$0xff]  ;;  %v44_v10 = vsub.f32 %v36_v3, %v28_v1  ;;  %v32_v11 = vld [vmem:[#allocation2 + $0x18] sm:$0xff]  ;;  %s258_s26 = scalar_lea.vmem %s192_s23, 128  ;;  %p263_p9 = scmp.lt.s32.totalorder %s192_s23, %s192_s23 }
  0x17   :  { %v46_v8 = vmul.f32 %v42_v5, %v42_v5  ;;  %v40_v17 = vld [vmem:[#allocation2 + $0x38] sm:$0xff]  ;;  %v61_v21 = vmul.f32 %v32_v11, %v30_v9  ;;  %v59_v25 = vmul.f32 %v30_v9, %v30_v9  ;;  %v65_v27 = vmul.f32 %v32_v11, %v32_v11  ;;  %p259_p8 = scmp.ne.s32.totalorder %s192_s23, %s258_s26  ;;  %p264_p10 = scmp.lt.s32.totalorder %s258_s26, %s258_s26 }
  0x18   :  { %v77_v13 = vmul.f32 %v43_v6, %v30_v9  ;;  %v79_v14 = vmul.f32 %v43_v6, %v32_v11  ;;  %v80_v15 = vmul.f32 %v44_v10, %v30_v9  ;;  %v84_v16 = vmul.f32 %v44_v10, %v32_v11 }
  0x19   :  { %v47_v12 = vmul.f32 %v46_v8, %v45_v7  ;;  %v49_v19 = vmul.f32 %v40_v17, %v40_v17  ;;  %v52_v20 = vmul.f32 %v40_v17, %v38_v4  ;;  %v70_v22 = vmul.f32 %v44_v10, %v43_v6  ;;  %p265_p11 = por %p264_p10, %p263_p9 }
  0x1a   :  { %v81_v18 = vadd.f32 %v80_v15, %v79_v14  ;;  %v62_v26 = vadd.f32 %v61_v21, %v61_v21  ;;  %v68_v28 = vmul.f32 %v43_v6, %v43_v6  ;;  %v74_v31 = vmul.f32 %v44_v10, %v44_v10 }
  0x1b   :  { %220 = vrcp.f32 %v47_v12  ;;  %v50_v23 = vadd.f32 %v49_v19, %v46_v8  ;;  %v53_v24 = vsub.f32 0.0, %v52_v20  ;;  %v71_v30 = vadd.f32 %v70_v22, %v70_v22  ;;  %p266_p12 = pnand %p265_p11, %p259_p8 }
  0x1c   :  { %222 = vlog2.f32 %v47_v12 }
  0x25   :  { %v221_v29 = vpop.eup %220 }
  0x26   :  { %v223_v32 = vpop.eup %222  ;;  %v51_v33 = vmul.f32 %v221_v29, %v50_v23  ;;  %v54_v34 = vmul.f32 %v221_v29, %v53_v24  ;;  %v55_v35 = vmul.f32 %v221_v29, %v45_v7 }
  0x27   :  { %v57_v36 = vmul.f32 0.6931472, %v223_v32 }
  0x28   :  { %v60_v37 = vmul.f32 %v59_v25, %v51_v33  ;;  %v63_v38 = vmul.f32 %v62_v26, %v54_v34  ;;  %v66_v39 = vmul.f32 %v65_v27, %v55_v35  ;;  %v69_v40 = vmul.f32 %v68_v28, %v51_v33 }
  0x29   :  { %v72_v41 = vmul.f32 %v71_v30, %v54_v34  ;;  %v75_v42 = vmul.f32 %v74_v31, %v55_v35  ;;  %v78_v43 = vmul.f32 %v77_v13, %v51_v33  ;;  %v82_v45 = vmul.f32 %v81_v18, %v54_v34 }
  0x2a   :  { %v64_v44 = vadd.f32 %v63_v38, %v60_v37  ;;  %v85_v46 = vmul.f32 %v84_v16, %v55_v35  ;;  %v58_v47 = vsub.f32 0.0, %v57_v36 }
  0x2b   :  { %v73_v48 = vadd.f32 %v72_v41, %v69_v40  ;;  %v83_v50 = vadd.f32 %v82_v45, %v78_v43 }
  0x2c   :  { %v67_v49 = vadd.f32 %v66_v39, %v64_v44  ;;  %v164_v54 = vmul.f32 0.5, %v58_v47 }
  0x2d   :  { %v76_v51 = vadd.f32 %v75_v42, %v73_v48  ;;  %v86_v52 = vadd.f32 %v85_v46, %v83_v50 }
  0x2e   :  { %v87_v53 = vadd.f32 2.0, %v67_v49 }
  0x2f   :  { %v163_v56 = vadd.f32 -1.1447299, %v86_v52 }
  0x30   :  { %v92_v55 = vmul.f32 %v87_v53, %v76_v51 }
  0x31   :  { %v340_v57 = vadd.f32 %v164_v54, %v163_v56 }
  0x32   :  { %224 = vrsqrt.f32 %v92_v55  ;;  %vm95_vm0 = vcmp.eq.f32.partialorder %v92_v55, inf  ;;  %v98_v59 = vand.u32 2147483648, %v92_v55  ;;  %vm97_vm1 = vcmp.eq.f32.partialorder %v92_v55, 0.0 }
  0x33   :  { %226 = vlog2.f32 %v76_v51 }
  0x34   :  { %228 = vlog2.f32 %v87_v53 }
  0x3c   :  { %v225_v58 = vpop.eup %224 }
  0x3d   :  { %v94_v60 = vmul.f32 %v225_v58, %v92_v55  ;;  %v227_v6 = vpop.eup %226 }
  0x3e   :  { %v229_v7 = vpop.eup %228  ;;  %v89_v12 = vmul.f32 0.6931472, %v227_v6 }
  0x3f   :  { %v96_v61 = vsel %vm95_vm0, %v92_v55, %v94_v60  ;;  %v91_v13 = vmul.f32 0.6931472, %v229_v7  ;;  %v173_v55 = vlaneseq }
  0x40   :  { %v342_v62 = vsel %vm97_vm1, %v98_v59, %v96_v61 }
  0x41   :  { %v102_v63 = vmul.f32 0.26666668, %v342_v62  ;;  %v117_v0 = vmul.f32 %v342_v62, %v342_v62  ;;  %v141_v1 = vmax.f32 %v342_v62, 1e-30  ;;  %v100_v19 = vadd.f32 %v91_v13, %v89_v12 }
  0x42   :  { %v166_v56 = vsub.f32 %v89_v12, %v91_v13  ;;  %v139_v60 = vmin.f32 %v342_v62, 2.0  ;;  %v174_v61 = vshrl.u32 %v173_v55, 7  ;;  %vm161_vm2 = vcmp.le.f32.partialorder %v342_v62, 2.0 }
  0x43   :  { %v103_v2 = vmul.f32 %v102_v63, %v102_v63  ;;  %v118_v3 = vmul.f32 0.25, %v117_v0  ;;  %230 = vrcp.f32 %v141_v1  ;;  %v101_v26 = vmul.f32 0.5, %v100_v19 }
  0x44   :  { %v167_v63 = vmul.f32 0.5, %v166_v56  ;;  %v178_v6 = vmul.u32 128, %v174_v61 }
  0x45   :  { %v104_v4 = vmul.f32 0.00032411, %v103_v2  ;;  %v123_v5 = vmul.f32 -4.686e-05, %v118_v3  ;;  %v214_v33 = vadd.f32 -0.6931472, %v101_v26 }
  0x46   :  { %v159_v1 = vmul.f32 0.5, %v101_v26  ;;  %v168_v7 = vadd.f32 %v167_v63, %v340_v57 }
  0x47   :  { %v105_v8 = vadd.f32 0.00301532, %v104_v4  ;;  %v124_v9 = vadd.f32 -0.00110404, %v123_v5  ;;  %v120_v39 = vmul.f32 %v214_v33, %v342_v62  ;;  %v176_v5 = vand.u32 127, %v173_v55 }
  0x49   :  { %v106_v10 = vmul.f32 %v105_v8, %v103_v2  ;;  %v125_v11 = vmul.f32 %v124_v9, %v118_v3 }
  0x4b   :  { %v107_v14 = vadd.f32 0.02658733, %v106_v10  ;;  %v126_v15 = vadd.f32 -0.01919402, %v125_v11  ;;  %v181_v10 = vadd.s32 %v178_v6, %v176_v5 }
  0x4d   :  { %v108_v16 = vmul.f32 %v107_v14, %v103_v2  ;;  %v127_v17 = vmul.f32 %v126_v15, %v118_v3  ;;  %v231_v18 = vpop.eup %230  ;;  %vm182_vm3 = vcmp.lt.s32.totalorder %v181_v10, 8 }
  0x4e   :  { %v143_v22 = vmul.f32 2.0, %v231_v18 }
  0x4f   :  { %v109_v20 = vadd.f32 0.15084934, %v108_v16  ;;  %v128_v21 = vadd.f32 -0.18156897, %v127_v17 }
  0x50   :  { %v144_v25 = vmul.f32 -0.00068245, %v143_v22 }
  0x51   :  { %v110_v23 = vmul.f32 %v109_v20, %v103_v2  ;;  %v129_v24 = vmul.f32 %v128_v21, %v118_v3 }
  0x52   :  { %v145_v29 = vadd.f32 0.00325614, %v144_v25 }
  0x53   :  { %v111_v27 = vadd.f32 0.51498866, %v110_v23  ;;  %v130_v28 = vadd.f32 -0.6727858, %v129_v24 }
  0x54   :  { %v146_v31 = vmul.f32 %v145_v29, %v143_v22 }
  0x55   :  { %v112_v30 = vmul.f32 %v111_v27, %v103_v2  ;;  %v131_v34 = vmul.f32 %v130_v28, %v118_v3 }
  0x56   :  { %v147_v35 = vadd.f32 -0.00780353, %v146_v31 }
  0x57   :  { %v113_v32 = vadd.f32 0.87890595, %v112_v30  ;;  %v132_v40 = vadd.f32 0.15443145, %v131_v34 }
  0x58   :  { %v148_v37 = vmul.f32 %v147_v35, %v143_v22 }
  0x59   :  { %v114_v36 = vmul.f32 %v113_v32, %v103_v2  ;;  %v133_v45 = vmul.f32 %v132_v40, %v118_v3 }
  0x5a   :  { %v149_v41 = vadd.f32 0.01504268, %v148_v37 }
  0x5b   :  { %v115_v38 = vadd.f32 0.5, %v114_v36 }
  0x5c   :  { %v150_v43 = vmul.f32 %v149_v41, %v143_v22 }
  0x5d   :  { %v116_v42 = vmul.f32 %v115_v38, %v342_v62 }
  0x5e   :  { %v151_v46 = vadd.f32 -0.0365562, %v150_v43 }
  0x5f   :  { %v121_v44 = vmul.f32 %v120_v39, %v116_v42 }
  0x60   :  { %v152_v48 = vmul.f32 %v151_v46, %v143_v22 }
  0x61   :  { %v122_v47 = vadd.f32 1.0, %v121_v44 }
  0x62   :  { %v153_v50 = vadd.f32 0.23498619, %v152_v48 }
  0x63   :  { %v134_v49 = vadd.f32 %v133_v45, %v122_v47 }
  0x64   :  { %v154_v52 = vmul.f32 %v153_v50, %v143_v22 }
  0x65   :  { %v135_v51 = vmax.f32 %v134_v49, 1e-30 }
  0x66   :  { %v155_v53 = vadd.f32 1.2533141, %v154_v52 }
  0x67   :  { %232 = vlog2.f32 %v135_v51 }
  0x68   :  { %v156_v54 = vmax.f32 %v155_v53, 1e-30 }
  0x6a   :  { %234 = vlog2.f32 %v156_v54 }
  0x71   :  { %v233_v58 = vpop.eup %232 }
  0x72   :  { %v137_v59 = vmul.f32 0.6931472, %v233_v58 }
  0x74   :  { %v138_v0 = vsub.f32 %v137_v59, %v101_v26  ;;  %v235_v2 = vpop.eup %234 }
  0x75   :  { %v158_v4 = vmul.f32 0.6931472, %v235_v2 }
  0x76   :  { %v140_v3 = vadd.f32 %v139_v60, %v138_v0 }
  0x77   :  { %v160_v8 = vsub.f32 %v158_v4, %v159_v1 }
  0x79   :  { %v162_v9 = vsel %vm161_vm2, %v140_v3, %v160_v8 }
  0x7a   :  { %v169_v11 = vadd.f32 %v168_v7, %v162_v9 }
  0x7c   :  { %v170_v12 = vsub.f32 %v169_v11, %v342_v62 }
  0x7e   :  { %v171_v13 = vsub.f32 0.0, %v170_v12 }
  0x80   :  { %172 = vst [vmem:[#allocation5] sm:$0xff] %v171_v13  ;;  %v183_v14 = vsel %vm182_vm3, %v171_v13, 0.0 }
  0x81   :  { %184 = vst [vmem:[#allocation6] sm:$0xff] %v183_v14 }
  0x82   :  { %269 = shalt.err (!%p266_p12)
}
  0x83   :  { %s270_s29 = scalar_lea.hbm %s386_s1, 128 }
  0x84   :  { %p271_p13 = scmp.ne.s32.totalorder %s386_s1, %s270_s29  ;;  %p274_p0 = scmp.lt.u32.totalorder %s270_s29, %s386_s1 }
  0x86   :  { %p276_p1 = pnand %p274_p0, %p271_p13 }
  0x88   :  { %279 = shalt.err (!%p276_p1)
}
  0x89   :  { %194 = dma.vmem_to_hbm [thread:$0]  %s192_s23, 128, %s386_s1, [#allocation4]  }
  0x8a   :  { %s280_s8 = scalar_lea.vmem %s354_s25, 128  ;;  %p285_p3 = scmp.lt.s32.totalorder %s354_s25, %s354_s25 }
  0x8b   :  { %p281_p2 = scmp.ne.s32.totalorder %s354_s25, %s280_s8  ;;  %p286_p4 = scmp.lt.s32.totalorder %s280_s8, %s280_s8 }
  0x8d   :  { %p287_p5 = por %p286_p4, %p285_p3 }
  0x8f   :  { %p288_p6 = pnand %p287_p5, %p281_p2 }
  0x91   :  { %291 = shalt.err (!%p288_p6)
}
  0x92   :  { %s292_s11 = scalar_lea.hbm %s387_s2, 128 }
  0x93   :  { %p293_p7 = scmp.ne.s32.totalorder %s387_s2, %s292_s11  ;;  %p296_p8 = scmp.lt.u32.totalorder %s292_s11, %s387_s2 }
  0x95   :  { %p298_p9 = pnand %p296_p8, %p293_p7 }
  0x97   :  { %301 = shalt.err (!%p298_p9)
}
  0x98   :  { %204 = dma.vmem_to_hbm [thread:$0]  %s354_s25, 128, %s387_s2, [#allocation7]  }
  0x99   :  { %304 = dma.done.wait [#allocation4], 128  }
  0x9a   :  { %305 = vsyncadd [#allocation4], 4294967168 }
  0x9b   :  { %306 = dma.done.wait [#allocation7], 128  }
  0x9c   :  { %307 = vsyncadd [#allocation7], 4294967168 }
  0x9d   :  { %211 = vsyncpa [#allocation3], 1 }
  0x9e   :  { %212 = vsyncpa [#allocation4], 1 }
  0x9f   :  { %213 = vsyncpa [#allocation7], 1 }

</bundles_post_ra>
